<compile_context>
chip_gen: v6e
topology: v6e:2x2x1
jax: 0.10.0
libtpu: 0.0.40
codegen_flags: <defaults>
</compile_context>

<pallas_src>
import functools

import jax
import jax.numpy as jnp
from jax.experimental import pallas as pl
from jax.experimental.pallas import tpu as pltpu


def _laa_kernel(x_ref, k_ref, o_ref, *, beta, inv_k2):
    # x_ref: (TB, HW) in the input dtype; k_ref: (HW, HW) 0/1 block-membership
    # operator in the input dtype (constant index_map, no per-step cast).
    x = x_ref[...]
    # block-mean broadcast back to full resolution: one lane-dense MXU matmul
    up = jnp.dot(x, k_ref[...], preferred_element_type=jnp.float32) * inv_k2
    xf = x.astype(jnp.float32)
    out = xf + (beta * jnp.maximum(xf - up, 0.0)) * xf
    o_ref[...] = out.astype(o_ref.dtype)


def local_aware_attention(x, kernel_size=4, stride=4, beta=0.07):
    """Pallas TPU implementation of LocalAwareAttention.forward (NCHW)."""
    assert kernel_size == stride, "module uses kernel_size == stride"
    N, C, H, W = x.shape
    k = kernel_size
    assert H % k == 0 and W % k == 0
    M, HW = N * C, H * W
    itemsize = x.dtype.itemsize

    # TODO(synk): planes with H*W > 1024 need k-aligned spatial tiling with
    # factored (rectangular) pool/upsample matrices instead of the dense
    # (HW, HW) operator; not needed for the shapes this module is used at.
    assert HW <= 1024, "large spatial planes not supported by this kernel"

    # Flattened-pixel block membership (== kron(B_h, B_w)): K[p, q] = 1 iff
    # pixels p and q fall in the same k x k block.  Built once, in x.dtype.
    pix = jnp.arange(HW)
    blk = (pix // W) // k * (W // k) + (pix % W) // k
    k01 = (blk[:, None] == blk[None, :]).astype(x.dtype)          # (HW, HW)
    inv_k2 = 1.0 / float(k * k)

    xf = x.reshape(M, HW)   # free view for contiguous NCHW

    # Row tile: batch planes until the input tile is ~2 MiB; multiple of 8 rows
    # (sublane) whenever we actually tile the row axis.
    target_rows = max(1, (2 << 20) // (HW * itemsize))
    tb = min(M, target_rows)
    if tb < M:
        tb = max(8, (tb // 8) * 8)
        tb = min(tb, M)
    grid = (pl.cdiv(M, tb),)

    # VMEM budget: double-buffered in/out tiles + the resident constant K.
    vmem_need = 2 * 2 * tb * HW * itemsize + 2 * HW * HW * itemsize + (1 << 20)
    vmem_limit = int(min(max(vmem_need, 32 << 20), 64 << 20))

    cost = pl.CostEstimate(
        flops=2 * M * HW * HW + 5 * M * HW,
        transcendentals=0,
        bytes_accessed=(2 * M * HW + HW * HW) * itemsize,
    )

    kernel = functools.partial(_laa_kernel, beta=beta, inv_k2=inv_k2)

    out = pl.pallas_call(
        kernel,
        out_shape=jax.ShapeDtypeStruct((M, HW), x.dtype),
        grid_spec=pltpu.PrefetchScalarGridSpec(
            num_scalar_prefetch=0,
            grid=grid,
            in_specs=[
                pl.BlockSpec((tb, HW), lambda i: (i, 0)),
                pl.BlockSpec((HW, HW), lambda i: (0, 0)),   # constant tile
            ],
            out_specs=pl.BlockSpec((tb, HW), lambda i: (i, 0)),
        ),
        compiler_params=pltpu.CompilerParams(
            dimension_semantics=("parallel",),
            vmem_limit_bytes=vmem_limit,
        ),
        cost_estimate=cost,
    )(xf, k01)

    return out.reshape(N, C, H, W)


def _reference(x, kernel_size=4, beta=0.07):
    N, C, H, W = x.shape
    k = kernel_size
    pooled = x.reshape(N, C, H // k, k, W // k, k).mean(axis=(3, 5))
    up = jnp.repeat(jnp.repeat(pooled, k, axis=2), k, axis=3)
    sub_relu = beta * jnp.maximum(x - up, 0.0)
    return x + sub_relu * x


if __name__ == "__main__":
    key = jax.random.PRNGKey(0)
    x = jax.random.normal(key, (2, 4, 16, 16), dtype=jnp.float32)

    out = local_aware_attention(x, kernel_size=4, stride=4, beta=0.07)
    out = jax.block_until_ready(out)

    ref = _reference(x, kernel_size=4, beta=0.07)
    assert out.shape == x.shape
    assert jnp.allclose(out, ref, atol=1e-5, rtol=1e-5), "mismatch vs reference"

    print("KERNEL_OK")
</pallas_src>

<mosaic_0001>
module attributes {stable_mosaic.version = 11 : i64} {
  func.func @_laa_kernel(%arg0: i32, %arg1: memref<8x256xf32, #tpu.memory_space<vmem>>, %arg2: memref<256x256xf32, #tpu.memory_space<vmem>>, %arg3: memref<8x256xf32, #tpu.memory_space<vmem>>) attributes {dimension_semantics = [#tpu.dimension_semantics<parallel>], iteration_bounds = array<i64: 1>, scalar_prefetch = 0 : i64, scratch_operands = 0 : i64, tpu.core_type = #tpu.core_type<tc>, window_params = [{transform_indices = @transform_0, window_bounds = array<i64: 8, 256>}, {pipeline_mode = #tpu.pipeline_mode<synchronous>, transform_indices = @transform_1, window_bounds = array<i64: 256, 256>}, {transform_indices = @transform_2, window_bounds = array<i64: 8, 256>}]} {
    %c0 = arith.constant 0 : index
    %c0_0 = arith.constant 0 : index
    %0 = vector.load %arg1[%c0, %c0_0] : memref<8x256xf32, #tpu.memory_space<vmem>>, vector<8x256xf32>
    %c0_1 = arith.constant 0 : index
    %c0_2 = arith.constant 0 : index
    %1 = vector.load %arg2[%c0_1, %c0_2] : memref<256x256xf32, #tpu.memory_space<vmem>>, vector<256x256xf32>
    %cst = arith.constant dense<0.000000e+00> : vector<8x256xf32>
    %2 = tpu.matmul %0, %1, %cst {dimension_numbers = #tpu.dot_dimension_numbers<[1], [0], [0], [1], [0, 0, 1, 1], [], []>} : vector<8x256xf32>, vector<256x256xf32>, vector<8x256xf32> -> vector<8x256xf32>
    %cst_3 = arith.constant 6.250000e-02 : f32
    %3 = vector.broadcast %cst_3 : f32 to vector<8x256xf32>
    %4 = arith.mulf %2, %3 : vector<8x256xf32>
    %5 = arith.subf %0, %4 : vector<8x256xf32>
    %cst_4 = arith.constant 0.000000e+00 : f32
    %6 = vector.broadcast %cst_4 : f32 to vector<8x256xf32>
    %7 = arith.maximumf %5, %6 : vector<8x256xf32>
    %cst_5 = arith.constant 7.000000e-02 : f32
    %8 = vector.broadcast %cst_5 : f32 to vector<8x256xf32>
    %9 = arith.mulf %8, %7 : vector<8x256xf32>
    %10 = arith.mulf %9, %0 : vector<8x256xf32>
    %11 = arith.addf %0, %10 : vector<8x256xf32>
    %c0_6 = arith.constant 0 : index
    %c0_7 = arith.constant 0 : index
    %12 = vector.load %arg3[%c0_6, %c0_7] : memref<8x256xf32, #tpu.memory_space<vmem>>, vector<8x256xf32>
    tpu.vector_store %arg3[%c0_6, %c0_7], %11 {strides = array<i32>} : memref<8x256xf32, #tpu.memory_space<vmem>>, vector<8x256xf32>,
    return
  }
  func.func @transform_0(%arg0: i32) -> (i32, i32) {
    %c0_i32 = arith.constant 0 : i32
    %c0_i32_0 = arith.constant 0 : i32
    return %arg0, %c0_i32 : i32, i32
  }
  func.func @transform_1(%arg0: i32) -> (i32, i32) {
    %c0_i32 = arith.constant 0 : i32
    %c0_i32_0 = arith.constant 0 : i32
    %c0_i32_1 = arith.constant 0 : i32
    return %c0_i32, %c0_i32_0 : i32, i32
  }
  func.func @transform_2(%arg0: i32) -> (i32, i32) {
    %c0_i32 = arith.constant 0 : i32
    %c0_i32_0 = arith.constant 0 : i32
    return %arg0, %c0_i32 : i32, i32
  }
}

</mosaic_0001>

<bundles_post_ra>
// kernel: tpu_custom_call.1
= control target key start
LH: loop header
LB: loop body
LE: loop exit
PB: predicated region body
PF: predicated region fallthrough
CT: control target
= control target key end

     0   :  { %7 = vsyncpa [#allocation3], 0  ;;  %s311_s0 = inlined_call_operand.hbm [shape: f32[8,256], index: 0, kind: input, shape index: {}]   ;;  %s312_s1 = inlined_call_operand.hbm [shape: f32[256,256], index: 1, kind: input, shape index: {}]   ;;  %s313_s2 = inlined_call_operand.hbm [shape: f32[8,256], index: 2, kind: output, shape index: {}]  }
   0x1   :  { %8 = vsyncpa [#allocation6], 0 }
   0x2   :  { %9 = vsyncpa [#allocation4], 0  ;;  %s276_s9 = smov [#allocation2]   ;;  %s277_s11 = smov [#allocation5]  }
   0x3   :  { %s16_s10 = sshll.u32 %s276_s9, 4  ;;  %s25_s12 = sshll.u32 %s277_s11, 4  ;;  %s17_s10 = int_to_ptr.vmem [resolvable:$true] %s16_s10  ;;  %s26_s12 = int_to_ptr.vmem [resolvable:$true] %s25_s12 }
   0x4   :  { %s218_s13 = scalar_lea.vmem %s17_s10, 256  ;;  %p223_p1 = scmp.lt.s32.totalorder %s17_s10, %s17_s10 }
   0x5   :  { %p219_p0 = scmp.ne.s32.totalorder %s17_s10, %s218_s13  ;;  %p224_p2 = scmp.lt.s32.totalorder %s218_s13, %s218_s13 }
   0x7   :  { %p225_p3 = por %p224_p2, %p223_p1 }
   0x9   :  { %p226_p4 = pnand %p225_p3, %p219_p0 }
   0xb   :  { %229 = shalt.err (!%p226_p4)
}
   0xc   :  { %19 = dma.hbm_to_vmem [thread:$0]  %s311_s0, 256, %s17_s10, [#allocation3]  }
   0xd   :  { %s238_s16 = scalar_lea.vmem %s26_s12, 8192  ;;  %p243_p6 = scmp.lt.s32.totalorder %s26_s12, %s26_s12 }
   0xe   :  { %p239_p5 = scmp.ne.s32.totalorder %s26_s12, %s238_s16  ;;  %p244_p7 = scmp.lt.s32.totalorder %s238_s16, %s238_s16 }
  0x10   :  { %p245_p8 = por %p244_p7, %p243_p6 }
  0x12   :  { %p246_p9 = pnand %p245_p8, %p239_p5 }
  0x14   :  { %249 = shalt.err (!%p246_p9)
}
  0x15   :  { %s278_s17 = smov 256   ;;  %s279_s18 = smov 16  }
  0x16   :  { %31 = dma.hbm_to_vmem [thread:$0]  %s312_s1, 8192, %s26_s12, [#allocation6], %s278_s17, %s278_s17, %s279_s18  }
  0x17   :  { %270 = dma.done.wait [#allocation3], 256  }
  0x18   :  { %271 = vsyncadd [#allocation3], 4294967040 }
  0x19   :  { %272 = dma.done.wait [#allocation6], 8192  }
  0x1a   :  { %273 = vsyncadd [#allocation6], 4294959104  ;;  %v71_v0 = vld [vmem:[#allocation5 + $0xf8] sm:$0xff]  ;;  %v70_v1 = vld [vmem:[#allocation5 + $0xf0] sm:$0xff]  ;;  %s280_s0 = smov [#allocation7]  }
  0x1b   :  { %v69_v2 = vld [vmem:[#allocation5 + $0xe8] sm:$0xff]  ;;  %104 = vmatprep.subr.mxu0 %v71_v0  ;;  %v68_v3 = vld [vmem:[#allocation5 + $0xe0] sm:$0xff]  ;;  %v67_v4 = vld [vmem:[#allocation5 + $0xd8] sm:$0xff]  ;;  %s195_s1 = sshll.u32 %s280_s0, 4  ;;  %s196_s1 = int_to_ptr.vmem [resolvable:$true] %s195_s1 }
  0x1c   :  { %105 = vmatpush1.msra.mxu0 %v70_v1  ;;  %v66_v5 = vld [vmem:[#allocation5 + $0xd0] sm:$0xff]  ;;  %v65_v6 = vld [vmem:[#allocation5 + $0xc8] sm:$0xff]  ;;  %v64_v7 = vld [vmem:[#allocation5 + $0xc0] sm:$0xff]  ;;  %s250_s21 = scalar_lea.vmem %s196_s1, 256  ;;  %p255_p11 = scmp.lt.s32.totalorder %s196_s1, %s196_s1 }
  0x1d   :  { %106 = vmatprep.subr.mxu0 %v69_v2  ;;  %v63_v8 = vld [vmem:[#allocation5 + $0xb8] sm:$0xff]  ;;  %v62_v9 = vld [vmem:[#allocation5 + $0xb0] sm:$0xff]  ;;  %v61_v10 = vld [vmem:[#allocation5 + $0xa8] sm:$0xff]  ;;  %p251_p10 = scmp.ne.s32.totalorder %s196_s1, %s250_s21  ;;  %p256_p12 = scmp.lt.s32.totalorder %s250_s21, %s250_s21 }
  0x1e   :  { %107 = vmatpush1.msra.mxu0 %v68_v3  ;;  %v60_v11 = vld [vmem:[#allocation5 + $0xa0] sm:$0xff]  ;;  %v59_v12 = vld [vmem:[#allocation5 + $0x98] sm:$0xff]  ;;  %v58_v13 = vld [vmem:[#allocation5 + $0x90] sm:$0xff] }
  0x1f   :  { %108 = vmatprep.subr.mxu0 %v67_v4  ;;  %v57_v14 = vld [vmem:[#allocation5 + $0x88] sm:$0xff]  ;;  %v56_v15 = vld [vmem:[#allocation5 + $0x80] sm:$0xff]  ;;  %v55_v16 = vld [vmem:[#allocation5 + $0x78] sm:$0xff]  ;;  %p257_p13 = por %p256_p12, %p255_p11 }
  0x20   :  { %109 = vmatpush1.msra.mxu0 %v66_v5  ;;  %v54_v17 = vld [vmem:[#allocation5 + $0x70] sm:$0xff]  ;;  %v53_v18 = vld [vmem:[#allocation5 + $0x68] sm:$0xff]  ;;  %v52_v19 = vld [vmem:[#allocation5 + $0x60] sm:$0xff] }
  0x21   :  { %110 = vmatprep.subr.mxu0 %v65_v6  ;;  %v51_v20 = vld [vmem:[#allocation5 + $0x58] sm:$0xff]  ;;  %v50_v21 = vld [vmem:[#allocation5 + $0x50] sm:$0xff]  ;;  %v49_v22 = vld [vmem:[#allocation5 + $0x48] sm:$0xff]  ;;  %p258_p0 = pnand %p257_p13, %p251_p10 }
  0x22   :  { %111 = vmatpush1.msra.mxu0 %v64_v7  ;;  %v48_v23 = vld [vmem:[#allocation5 + $0x40] sm:$0xff]  ;;  %v302_v24 = vld [vmem:[#allocation2 + $0x8] sm:$0xff]  ;;  %v46_v26 = vld [vmem:[#allocation5 + $0x30] sm:$0xff] }
  0x23   :  { %112 = vmatprep.subr.mxu0 %v63_v8  ;;  %v47_v25 = vld [vmem:[#allocation5 + $0x38] sm:$0xff]  ;;  %168 = vmatprep.mubr.f32.mxu0 %v302_v24  ;;  %v45_v27 = vld [vmem:[#allocation5 + $0x28] sm:$0xff]  ;;  %v44_v28 = vld [vmem:[#allocation5 + $0x20] sm:$0xff] }
  0x24   :  { %113 = vmatpush1.msra.mxu0 %v62_v9  ;;  %v43_v29 = vld [vmem:[#allocation5 + $0x18] sm:$0xff]  ;;  %v42_v30 = vld [vmem:[#allocation5 + $0x10] sm:$0xff]  ;;  %v41_v31 = vld [vmem:[#allocation5 + $0x8] sm:$0xff] }
  0x25   :  { %114 = vmatprep.subr.mxu0 %v61_v10  ;;  %v40_v32 = vld [vmem:[#allocation5] sm:$0xff]  ;;  %v103_v33 = vld [vmem:[#allocation5 + $0x1f8] sm:$0xff]  ;;  %v102_v34 = vld [vmem:[#allocation5 + $0x1f0] sm:$0xff] }
  0x26   :  { %115 = vmatpush1.msra.mxu0 %v60_v11  ;;  %v101_v35 = vld [vmem:[#allocation5 + $0x1e8] sm:$0xff]  ;;  %v100_v36 = vld [vmem:[#allocation5 + $0x1e0] sm:$0xff]  ;;  %v99_v37 = vld [vmem:[#allocation5 + $0x1d8] sm:$0xff] }
  0x27   :  { %116 = vmatprep.subr.mxu0 %v59_v12  ;;  %v98_v38 = vld [vmem:[#allocation5 + $0x1d0] sm:$0xff]  ;;  %v97_v39 = vld [vmem:[#allocation5 + $0x1c8] sm:$0xff]  ;;  %v96_v40 = vld [vmem:[#allocation5 + $0x1c0] sm:$0xff] }
  0x28   :  { %117 = vmatpush1.msra.mxu0 %v58_v13  ;;  %v95_v41 = vld [vmem:[#allocation5 + $0x1b8] sm:$0xff]  ;;  %v94_v42 = vld [vmem:[#allocation5 + $0x1b0] sm:$0xff]  ;;  %v93_v43 = vld [vmem:[#allocation5 + $0x1a8] sm:$0xff] }
  0x29   :  { %118 = vmatprep.subr.mxu0 %v57_v14  ;;  %v92_v44 = vld [vmem:[#allocation5 + $0x1a0] sm:$0xff]  ;;  %v91_v45 = vld [vmem:[#allocation5 + $0x198] sm:$0xff]  ;;  %v90_v46 = vld [vmem:[#allocation5 + $0x190] sm:$0xff] }
  0x2a   :  { %119 = vmatpush1.msra.mxu0 %v56_v15  ;;  %v89_v47 = vld [vmem:[#allocation5 + $0x188] sm:$0xff]  ;;  %v88_v48 = vld [vmem:[#allocation5 + $0x180] sm:$0xff]  ;;  %v87_v49 = vld [vmem:[#allocation5 + $0x178] sm:$0xff] }
  0x2b   :  { %120 = vmatprep.subr.mxu0 %v55_v16  ;;  %v86_v50 = vld [vmem:[#allocation5 + $0x170] sm:$0xff]  ;;  %v85_v51 = vld [vmem:[#allocation5 + $0x168] sm:$0xff]  ;;  %v84_v52 = vld [vmem:[#allocation5 + $0x160] sm:$0xff] }
  0x2c   :  { %121 = vmatpush1.msra.mxu0 %v54_v17  ;;  %v83_v53 = vld [vmem:[#allocation5 + $0x158] sm:$0xff]  ;;  %v82_v54 = vld [vmem:[#allocation5 + $0x150] sm:$0xff]  ;;  %v81_v55 = vld [vmem:[#allocation5 + $0x148] sm:$0xff] }
  0x2d   :  { %122 = vmatprep.subr.mxu0 %v53_v18  ;;  %v80_v56 = vld [vmem:[#allocation5 + $0x140] sm:$0xff]  ;;  %v79_v57 = vld [vmem:[#allocation5 + $0x138] sm:$0xff]  ;;  %v78_v58 = vld [vmem:[#allocation5 + $0x130] sm:$0xff] }
  0x2e   :  { %123 = vmatpush1.msra.mxu0 %v52_v19  ;;  %v77_v59 = vld [vmem:[#allocation5 + $0x128] sm:$0xff]  ;;  %v76_v60 = vld [vmem:[#allocation5 + $0x120] sm:$0xff]  ;;  %v75_v61 = vld [vmem:[#allocation5 + $0x118] sm:$0xff] }
  0x2f   :  { %124 = vmatprep.subr.mxu0 %v51_v20  ;;  %v74_v62 = vld [vmem:[#allocation5 + $0x110] sm:$0xff]  ;;  %v73_v63 = vld [vmem:[#allocation5 + $0x108] sm:$0xff]  ;;  %v72_v0 = vld [vmem:[#allocation5 + $0x100] sm:$0xff] }
  0x30   :  { %125 = vmatpush1.msra.mxu0 %v50_v21  ;;  %v38_v1 = vld [vmem:[#allocation2] sm:$0xff] }
  0x31   :  { %126 = vmatprep.subr.mxu0 %v49_v22 }
  0x32   :  { %127 = vmatpush1.msra.mxu0 %v48_v23 }
  0x33   :  { %128 = vmatprep.subr.mxu0 %v47_v25 }
  0x34   :  { %129 = vmatpush1.msra.mxu0 %v46_v26 }
  0x35   :  { %130 = vmatprep.subr.mxu0 %v45_v27 }
  0x36   :  { %131 = vmatpush1.msra.mxu0 %v44_v28 }
  0x37   :  { %132 = vmatprep.subr.mxu0 %v43_v29 }
  0x38   :  { %133 = vmatpush1.msra.mxu0 %v42_v30 }
  0x39   :  { %134 = vmatprep.subr.mxu0 %v41_v31 }
  0x3a   :  { %135 = vmatpush1.msra.mxu0 %v40_v32 }
  0x3b   :  { %136 = vmatprep.subr.mxu0 %v103_v33 }
  0x3c   :  { %137 = vmatpush2.msra.mxu0 %v102_v34 }
  0x3d   :  { %138 = vmatprep.subr.mxu0 %v101_v35 }
  0x3e   :  { %139 = vmatpush2.msra.mxu0 %v100_v36 }
  0x3f   :  { %140 = vmatprep.subr.mxu0 %v99_v37 }
  0x40   :  { %141 = vmatpush2.msra.mxu0 %v98_v38 }
  0x41   :  { %142 = vmatprep.subr.mxu0 %v97_v39 }
  0x42   :  { %143 = vmatpush2.msra.mxu0 %v96_v40 }
  0x43   :  { %144 = vmatprep.subr.mxu0 %v95_v41 }
  0x44   :  { %145 = vmatpush2.msra.mxu0 %v94_v42 }
  0x45   :  { %146 = vmatprep.subr.mxu0 %v93_v43 }
  0x46   :  { %147 = vmatpush2.msra.mxu0 %v92_v44 }
  0x47   :  { %148 = vmatprep.subr.mxu0 %v91_v45 }
  0x48   :  { %149 = vmatpush2.msra.mxu0 %v90_v46 }
  0x49   :  { %150 = vmatprep.subr.mxu0 %v89_v47 }
  0x4a   :  { %151 = vmatpush2.msra.mxu0 %v88_v48 }
  0x4b   :  { %152 = vmatprep.subr.mxu0 %v87_v49 }
  0x4c   :  { %153 = vmatpush2.msra.mxu0 %v86_v50 }
  0x4d   :  { %154 = vmatprep.subr.mxu0 %v85_v51 }
  0x4e   :  { %155 = vmatpush2.msra.mxu0 %v84_v52 }
  0x4f   :  { %156 = vmatprep.subr.mxu0 %v83_v53 }
  0x50   :  { %157 = vmatpush2.msra.mxu0 %v82_v54 }
  0x51   :  { %158 = vmatprep.subr.mxu0 %v81_v55 }
  0x52   :  { %159 = vmatpush2.msra.mxu0 %v80_v56 }
  0x53   :  { %160 = vmatprep.subr.mxu0 %v79_v57 }
  0x54   :  { %161 = vmatpush2.msra.mxu0 %v78_v58 }
  0x55   :  { %162 = vmatprep.subr.mxu0 %v77_v59 }
  0x56   :  { %163 = vmatpush2.msra.mxu0 %v76_v60 }
  0x57   :  { %164 = vmatprep.subr.mxu0 %v75_v61 }
  0x58   :  { %165 = vmatpush2.msra.mxu0 %v74_v62 }
  0x59   :  { %166 = vmatprep.subr.mxu0 %v73_v63 }
  0x5a   :  { %167 = vmatpush2.msra.mxu0 %v72_v0 }
  0x5b   :  { %169 = vmatmul.mubr.f32.vlgmr.msra.gmra.mxu0 %v38_v1 }
 0x11b   :  { %v170_v2 = vpop.f32.mrf.mxu0 }
 0x11c   :  { %v175_v3 = vmul.f32 0.0625, %v170_v2 }
 0x11d   :  { %v172_v4 = vpop.f32.mrf.mxu0 }
 0x11e   :  { %v177_v5 = vsub.f32 %v38_v1, %v175_v3  ;;  %v176_v6 = vmul.f32 0.0625, %v172_v4 }
 0x120   :  { %v179_v7 = vmax.f32 %v177_v5, 0.0  ;;  %v178_v8 = vsub.f32 %v302_v24, %v176_v6 }
 0x122   :  { %v181_v9 = vmul.f32 0.07, %v179_v7  ;;  %v180_v10 = vmax.f32 %v178_v8, 0.0 }
 0x124   :  { %v183_v11 = vmul.f32 %v181_v9, %v38_v1  ;;  %v182_v12 = vmul.f32 0.07, %v180_v10 }
 0x126   :  { %v184_v13 = vmul.f32 %v182_v12, %v302_v24  ;;  %v185_v14 = vadd.f32 %v183_v11, %v38_v1 }
 0x128   :  { %v186_v15 = vadd.f32 %v184_v13, %v302_v24  ;;  %187 = vst [vmem:[#allocation7] sm:$0xff] %v185_v14 }
 0x12a   :  { %188 = vst [vmem:[#allocation7 + $0x8] sm:$0xff] %v186_v15 }
 0x12b   :  { %261 = shalt.err (!%p258_p0)
}
 0x12c   :  { %198 = dma.vmem_to_hbm [thread:$0]  %s196_s1, 256, %s313_s2, [#allocation4]  }
 0x12d   :  { %274 = dma.done.wait [#allocation4], 256  }
 0x12e   :  { %275 = vsyncadd [#allocation4], 4294967040 }
 0x12f   :  { %202 = vsyncpa [#allocation3], 1 }
 0x130   :  { %203 = vsyncpa [#allocation6], 1 }
 0x131   :  { %204 = vsyncpa [#allocation4], 1 }

</bundles_post_ra>
